<compile_context>
chip_gen: v5e
topology: v5e:2x2
jax: 0.10.0
libtpu: 0.0.40
codegen_flags: <defaults>
</compile_context>

<pallas_src>
import jax
import jax.numpy as jnp
from jax.experimental import pallas as pl
from jax.experimental.pallas import tpu as pltpu


def _disc_kernel(x_ref, w_ref, b1_ref, w2_ref, b2_ref, o_ref):
    # x_ref : [TB, Kp]     activations [z | y | 0-pad], caller dtype
    # w_ref : [Kp, 1024]   fused Wp@W1 (zero-padded rows), bf16 (or f32)
    # b1_ref: [1, 1024]    f32
    # w2_ref: [1, 1024]    f32  (second linear weight, transposed)
    # b2_ref: [1, 1]       f32  scalar in SMEM
    # o_ref : [1, 1, TB]   f32  lane-dense logit row
    xb = x_ref[...].astype(w_ref.dtype)

    # fused (projection -> Linear(rp, 1024)): single MXU pass, f32 accumulate
    h = jnp.dot(xb, w_ref[...], preferred_element_type=jnp.float32)
    h = h + b1_ref[...]
    # LeakyReLU (nn.LeakyReLU default negative_slope=0.01)
    h = jnp.where(h >= 0, h, 0.01 * h)

    # Linear(1024, 1): VPU multiply + lane reduction (no N=1 MXU pass).
    # The (TB,) column->lane relayout rides the XLU, which has slack here,
    # and gives a lane-dense [1, 1, TB] store (no masked partial stores).
    logit = jnp.sum(h * w2_ref[...], axis=-1) + b2_ref[0, 0]
    o_ref[...] = jax.nn.sigmoid(logit)[None, None, :].astype(o_ref.dtype)


def prepare_kernel_params(params, use_bf16_weights=True):
    """One-time offline prep: fuse projection @ first linear (no nonlinearity
    sits between them, so exact up to rounding), zero-pad the contraction dim
    to a 16-row multiple (bf16 sublane packing), cast for DMA/MXU.
    Set use_bf16_weights=False for strict parity with a trained f32 checkpoint.
    """
    w_fused = params["wp"] @ params["w1"]                      # [d_in, 1024] f32
    d_in = w_fused.shape[0]
    k_pad = ((d_in + 15) // 16) * 16
    if k_pad != d_in:
        w_fused = jnp.pad(w_fused, ((0, k_pad - d_in), (0, 0)))
    w_dtype = jnp.bfloat16 if use_bf16_weights else jnp.float32
    # TODO(synk): on v5e/v6e the fused weight could be int8 + per-tensor scale
    # (halves the resident weight DMA); v7x's MXU has no int8 path, so skipped.
    return {
        "w1f": w_fused.astype(w_dtype),                         # [Kp, 1024]
        "b1": params["b1"].astype(jnp.float32),                 # [1, 1024]
        "w2t": params["w2"].reshape(1, -1).astype(jnp.float32), # [1, 1024]
        "b2": params["b2"].reshape(1, 1).astype(jnp.float32),   # [1, 1]
        "d_in": d_in,
    }


def _round_up(x, m):
    return ((x + m - 1) // m) * m


def discriminator_forward(y, z, kparams):
    """y: [B, num_labels], z: [B, ...] (flattened to [B, hidden])."""
    B = z.shape[0]
    # Pack [z | y] in the caller's native dtype (no forced f32 upcast) and
    # zero-pad the feature axis to match the padded fused weight (zero rows
    # of W x zero cols of x contribute nothing -> exact).
    x = jnp.concatenate([z.reshape(B, -1), y], axis=1)
    d_in = x.shape[1]
    k_pad = kparams["w1f"].shape[0]
    if k_pad != d_in:
        x = jnp.pad(x, ((0, 0), (0, k_pad - d_in)))
    hid = kparams["w1f"].shape[1]

    # Batch tiling: one tile for tiny B; otherwise at least two grid steps
    # (so v7x's second TensorCore gets work via the "parallel" axis), with the
    # tile capped at 1024 rows (measured DMA sweet spot, VMEM-safe on all of
    # v5e/v6e/v7x). Tile rounded to 16 so bf16 activation blocks pack cleanly.
    if B <= 16:
        tb = _round_up(B, 8)
    else:
        tb = min(1024, _round_up((B + 1) // 2, 16))
    b_pad = _round_up(B, tb)
    if b_pad != B:
        x = jnp.pad(x, ((0, b_pad - B), (0, 0)))
    g = b_pad // tb

    def resident(shape):
        # Constant block index -> operand stays resident in VMEM across steps.
        # TODO(synk): pipeline_mode=pl.Buffered(1) would drop the unused second
        # buffer on these residents; left at the default for lowering safety.
        return pl.BlockSpec(shape, lambda i: (0, 0))

    out = pl.pallas_call(
        _disc_kernel,
        out_shape=jax.ShapeDtypeStruct((g, 1, tb), jnp.float32),
        grid=(g,),
        in_specs=[
            pl.BlockSpec((tb, k_pad), lambda i: (i, 0)),        # activations
            resident((k_pad, hid)),                             # fused W
            resident((1, hid)),                                 # b1
            resident((1, hid)),                                 # w2^T (f32)
            pl.BlockSpec(memory_space=pltpu.MemorySpace.SMEM),  # b2 scalar
        ],
        # lane-dense logit row per grid step
        out_specs=pl.BlockSpec((1, 1, tb), lambda i: (i, 0, 0)),
        compiler_params=pltpu.CompilerParams(
            dimension_semantics=("parallel",),
            # within v7x's 64 MiB physical / 32 MiB scoped-VMEM default
            vmem_limit_bytes=32 * 1024 * 1024,
        ),
    )(x, kparams["w1f"], kparams["b1"], kparams["w2t"], kparams["b2"])

    # TODO(synk): for the tiny-B serving case the cost is pure launch + the
    # one-time weight DMA; fusing this head into the surrounding step's kernel
    # (or keeping weights resident via a cross-pallas_call future) is the only
    # remaining lever.
    return out.reshape(b_pad, 1)[:B]


def init_params(key, hidden_size, num_labels, rp_size=256):
    d_in = hidden_size + num_labels
    k1, k2, k3, k4, k5 = jax.random.split(key, 5)
    # deterministic synthetic init (scaled normal), stored transposed: [in, out]
    wp = jax.random.normal(k1, (d_in, rp_size), jnp.float32) * 0.02
    # projection.weight.div_(torch.norm(weight)) -> Frobenius norm of matrix
    wp = wp / jnp.linalg.norm(wp)
    w1 = jax.random.normal(k2, (rp_size, 1024), jnp.float32) * 0.02
    b1 = jax.random.normal(k3, (1, 1024), jnp.float32) * 0.01
    w2 = jax.random.normal(k4, (1024, 1), jnp.float32) * 0.02
    b2 = jax.random.normal(k5, (1, 1), jnp.float32) * 0.01
    return {"wp": wp, "w1": w1, "b1": b1, "w2": w2, "b2": b2}


if __name__ == "__main__":
    hidden_size = 32
    num_labels = 8
    rp_size = 256
    B = 8

    key = jax.random.PRNGKey(0)
    kp, ky, kz = jax.random.split(key, 3)
    params = init_params(kp, hidden_size, num_labels, rp_size)
    kparams = prepare_kernel_params(params)

    y = jax.random.normal(ky, (B, num_labels), jnp.float32)
    z = jax.random.normal(kz, (B, hidden_size), jnp.float32)

    logit = discriminator_forward(y, z, kparams)
    jax.block_until_ready(logit)

    # reference check in plain JAX (full f32, unfused weights)
    x = jnp.concatenate([z.reshape(B, -1), y], axis=1)
    h = x @ params["wp"] @ params["w1"] + params["b1"]
    h = jnp.where(h >= 0, h, 0.01 * h)
    ref = jax.nn.sigmoid(h @ params["w2"] + params["b2"])
    assert logit.shape == (B, 1)
    assert jnp.allclose(logit, ref, atol=1e-3, rtol=0), (
        float(jnp.max(jnp.abs(logit - ref))))

    print("KERNEL_OK")
</pallas_src>

<mosaic_0001>
module attributes {stable_mosaic.version = 11 : i64} {
  func.func @_disc_kernel(%arg0: i32, %arg1: memref<8x48xf32, #tpu.memory_space<vmem>>, %arg2: memref<48x1024xbf16, #tpu.memory_space<vmem>>, %arg3: memref<1x1024xf32, #tpu.memory_space<vmem>>, %arg4: memref<1x1024xf32, #tpu.memory_space<vmem>>, %arg5: memref<1x1xf32, #tpu.memory_space<smem>>, %arg6: memref<1x1x8xf32, #tpu.memory_space<vmem>>) attributes {dimension_semantics = [#tpu.dimension_semantics<parallel>], iteration_bounds = array<i64: 1>, scalar_prefetch = 0 : i64, scratch_operands = 0 : i64, tpu.core_type = #tpu.core_type<tc>, window_params = [{transform_indices = @transform_0, window_bounds = array<i64: 8, 48>}, {pipeline_mode = #tpu.pipeline_mode<synchronous>, transform_indices = @transform_1, window_bounds = array<i64: 48, 1024>}, {pipeline_mode = #tpu.pipeline_mode<synchronous>, transform_indices = @transform_2, window_bounds = array<i64: 1, 1024>}, {pipeline_mode = #tpu.pipeline_mode<synchronous>, transform_indices = @transform_3, window_bounds = array<i64: 1, 1024>}, {transform_indices = @transform_4, window_bounds = array<i64: 1, 1>}, {transform_indices = @transform_5, window_bounds = array<i64: 1, 1, 8>}]} {
    %c0 = arith.constant 0 : index
    %c0_0 = arith.constant 0 : index
    %0 = vector.load %arg1[%c0, %c0_0] : memref<8x48xf32, #tpu.memory_space<vmem>>, vector<8x48xf32>
    %1 = arith.truncf %0 : vector<8x48xf32> to vector<8x48xbf16>
    %c0_1 = arith.constant 0 : index
    %c0_2 = arith.constant 0 : index
    %2 = vector.load %arg2[%c0_1, %c0_2] : memref<48x1024xbf16, #tpu.memory_space<vmem>>, vector<48x1024xbf16>
    %cst = arith.constant dense<0.000000e+00> : vector<8x1024xf32>
    %3 = tpu.matmul %1, %2, %cst {dimension_numbers = #tpu.dot_dimension_numbers<[1], [0], [0], [1], [0, 0, 1, 1], [], []>} : vector<8x48xbf16>, vector<48x1024xbf16>, vector<8x1024xf32> -> vector<8x1024xf32>
    %c0_3 = arith.constant 0 : index
    %c0_4 = arith.constant 0 : index
    %4 = vector.load %arg3[%c0_3, %c0_4] : memref<1x1024xf32, #tpu.memory_space<vmem>>, vector<1x1024xf32>
    %5 = vector.broadcast %4 : vector<1x1024xf32> to vector<8x1024xf32>
    %6 = arith.addf %3, %5 : vector<8x1024xf32>
    %cst_5 = arith.constant 0.000000e+00 : f32
    %7 = vector.broadcast %cst_5 : f32 to vector<8x1024xf32>
    %8 = arith.cmpf oge, %6, %7 : vector<8x1024xf32>
    %cst_6 = arith.constant 0.00999999977 : f32
    %9 = vector.broadcast %cst_6 : f32 to vector<8x1024xf32>
    %10 = arith.mulf %9, %6 : vector<8x1024xf32>
    %11 = arith.select %8, %6, %10 : vector<8x1024xi1>, vector<8x1024xf32>
    %c0_7 = arith.constant 0 : index
    %c0_8 = arith.constant 0 : index
    %12 = vector.load %arg4[%c0_7, %c0_8] : memref<1x1024xf32, #tpu.memory_space<vmem>>, vector<1x1024xf32>
    %13 = vector.broadcast %12 : vector<1x1024xf32> to vector<8x1024xf32>
    %14 = arith.mulf %11, %13 : vector<8x1024xf32>
    %cst_9 = arith.constant dense<0.000000e+00> : vector<8xf32>
    %15 = vector.multi_reduction <add>, %14, %cst_9 [1] : vector<8x1024xf32> to vector<8xf32>
    %c0_10 = arith.constant 0 : index
    %c0_11 = arith.constant 0 : index
    %16 = memref.load %arg5[%c0_10, %c0_11] : memref<1x1xf32, #tpu.memory_space<smem>>
    %17 = vector.broadcast %16 : f32 to vector<8xf32>
    %18 = arith.addf %15, %17 : vector<8xf32>
    %19 = arith.negf %18 : vector<8xf32>
    %20 = math.exp %19 : vector<8xf32>
    %cst_12 = arith.constant 1.000000e+00 : f32
    %21 = vector.broadcast %cst_12 : f32 to vector<8xf32>
    %22 = arith.addf %21, %20 : vector<8xf32>
    %23 = arith.divf %21, %22 : vector<8xf32>
    %24 = vector.shape_cast %23 : vector<8xf32> to vector<1x1x8xf32>
    %c0_13 = arith.constant 0 : index
    %c0_14 = arith.constant 0 : index
    %c0_15 = arith.constant 0 : index
    %25 = vector.load %arg6[%c0_13, %c0_14, %c0_15] : memref<1x1x8xf32, #tpu.memory_space<vmem>>, vector<1x1x8xf32>
    tpu.vector_store %arg6[%c0_13, %c0_14, %c0_15], %24 {strides = array<i32>} : memref<1x1x8xf32, #tpu.memory_space<vmem>>, vector<1x1x8xf32>,
    return
  }
  func.func @transform_0(%arg0: i32) -> (i32, i32) {
    %c0_i32 = arith.constant 0 : i32
    %c0_i32_0 = arith.constant 0 : i32
    return %arg0, %c0_i32 : i32, i32
  }
  func.func @transform_1(%arg0: i32) -> (i32, i32) {
    %c0_i32 = arith.constant 0 : i32
    %c0_i32_0 = arith.constant 0 : i32
    %c0_i32_1 = arith.constant 0 : i32
    return %c0_i32, %c0_i32_0 : i32, i32
  }
  func.func @transform_2(%arg0: i32) -> (i32, i32) {
    %c0_i32 = arith.constant 0 : i32
    %c0_i32_0 = arith.constant 0 : i32
    %c0_i32_1 = arith.constant 0 : i32
    return %c0_i32, %c0_i32_0 : i32, i32
  }
  func.func @transform_3(%arg0: i32) -> (i32, i32) {
    %c0_i32 = arith.constant 0 : i32
    %c0_i32_0 = arith.constant 0 : i32
    %c0_i32_1 = arith.constant 0 : i32
    return %c0_i32, %c0_i32_0 : i32, i32
  }
  func.func @transform_4(%arg0: i32) -> (i32, i32) {
    %c0_i32 = arith.constant 0 : i32
    %c0_i32_0 = arith.constant 0 : i32
    %c0_i32_1 = arith.constant 0 : i32
    return %c0_i32, %c0_i32_0 : i32, i32
  }
  func.func @transform_5(%arg0: i32) -> (i32, i32, i32) {
    %c0_i32 = arith.constant 0 : i32
    %c0_i32_0 = arith.constant 0 : i32
    %c0_i32_1 = arith.constant 0 : i32
    return %arg0, %c0_i32, %c0_i32_0 : i32, i32, i32
  }
}

</mosaic_0001>

<bundles_post_ra>
// kernel: tpu_custom_call.1
= control target key start
LH: loop header
LB: loop body
LE: loop exit
PB: predicated region body
PF: predicated region fallthrough
CT: control target
= control target key end

     0   :  { %11 = vsyncpa [#allocation4], 0  ;;  %s810_s0 = inlined_call_operand.hbm [shape: f32[8,48], index: 0, kind: input, shape index: {}]   ;;  %s811_s1 = inlined_call_operand.hbm [shape: bf16[48,1024], index: 1, kind: input, shape index: {}]   ;;  %s812_s2 = inlined_call_operand.hbm [shape: f32[1,1024], index: 2, kind: input, shape index: {}]   ;;  %s813_s3 = inlined_call_operand.hbm [shape: f32[1,1024], index: 3, kind: input, shape index: {}]   ;;  %s814_s4 = inlined_call_operand.<no memory space> [shape: f32[1,1], index: 4, kind: input, shape index: {}]   ;;  %s815_s5 = inlined_call_operand.hbm [shape: f32[1,1,8], index: 5, kind: output, shape index: {}]  }
   0x1   :  { %12 = vsyncpa [#allocation7], 0 }
   0x2   :  { %13 = vsyncpa [#allocation10], 0  ;;  %s30_s20 = sshll.u32 %s811_s1, 4  ;;  %s31_s20 = int_to_ptr.hbm [resolvable:$true] %s30_s20 }
   0x3   :  { %14 = vsyncpa [#allocation5], 0  ;;  %s727_s21 = smov [#allocation6]   ;;  %s20_s25 = sshll.u32 %s810_s0, 4  ;;  %s21_s25 = int_to_ptr.hbm [resolvable:$true] %s20_s25 }
   0x4   :  { %s32_s22 = sshll.u32 %s727_s21, 4  ;;  %s728_s26 = smov 512   ;;  %s33_s22 = int_to_ptr.vmem [resolvable:$true] %s32_s22 }
   0x5   :  { %s729_s27 = smov 32   ;;  %s730_s28 = smov [#allocation3]  }
   0x6   :  { %38 = dma.hbm_to_vmem [thread:$0]  %s31_s20, 3072, %s33_s22, [#allocation7], %s728_s26, %s728_s26, %s729_s27  }
   0x7   :  { %s22_s29 = sshll.u32 %s730_s28, 4  ;;  %s44_s7 = sshll.u32 %s812_s2, 4  ;;  %s23_s29 = int_to_ptr.vmem [resolvable:$true] %s22_s29  ;;  %s45_s7 = int_to_ptr.hbm [resolvable:$true] %s44_s7 }
   0x8   :  { %25 = dma.hbm_to_vmem [thread:$0]  %s21_s25, 128, %s23_s29, [#allocation4]  }
   0x9   :  { %s55_s9 = sshll.u32 %s813_s3, 4  ;;  %s731_s10 = smov [#allocation8]   ;;  %s56_s9 = int_to_ptr.hbm [resolvable:$true] %s55_s9 }
   0xa   :  { %s46_s11 = sshll.u32 %s731_s10, 4  ;;  %s732_s0 = smov [#allocation9]   ;;  %s47_s11 = int_to_ptr.vmem [resolvable:$true] %s46_s11 }
   0xb   :  { %49 = dma.hbm_to_vmem [thread:$0]  %s45_s7, 128, %s47_s11, [#allocation7]  }
   0xc   :  { %s57_s12 = sshll.u32 %s732_s0, 4  ;;  %s58_s12 = int_to_ptr.vmem [resolvable:$true] %s57_s12 }
   0xd   :  { %60 = dma.hbm_to_vmem [thread:$0]  %s56_s9, 128, %s58_s12, [#allocation10]  }
   0xe   :  { %719 = dma.done.wait [#allocation4], 128  }
   0xf   :  { %720 = vsyncadd [#allocation4], 4294967168 }
  0x10   :  { %721 = dma.done.wait [#allocation7], 3200  }
  0x11   :  { %722 = vsyncadd [#allocation7], 4294964096 }
  0x12   :  { %723 = dma.done.wait [#allocation10], 128  }
  0x13   :  { %724 = vsyncadd [#allocation10], 4294967168  ;;  %v525_v0 = vld [vmem:[#allocation6 + $0x80] sm:$0xf]  ;;  %v580_v2 = vld [vmem:[#allocation6 + $0x84] sm:$0xf] }
  0x14   :  { %v584_v1 = vld [vmem:[#allocation6 + $0x9c] sm:$0xf0]  ;;  %v527_v4 = vld [vmem:[#allocation6 + $0xa0] sm:$0xf0]  ;;  %v533_v5 = vld [vmem:[#allocation6 + $0x88] sm:$0xf] }
  0x15   :  { %v526_v3 = vor.u32 %v584_v1, %v525_v0  ;;  %v585_v6 = vld [vmem:[#allocation6 + $0xa4] sm:$0xf0]  ;;  %v530_v7 = vor.u32 %v580_v2, %v527_v4  ;;  %v581_v9 = vld [vmem:[#allocation6 + $0x8c] sm:$0xf]  ;;  %v493_v11 = vld [vmem:[#allocation6 + $0x40] sm:$0xf] }
  0x16   :  { %v534_v8 = vor.u32 %v585_v6, %v533_v5  ;;  %v535_v10 = vld [vmem:[#allocation6 + $0xa8] sm:$0xf0]  ;;  %v576_v13 = vld [vmem:[#allocation6 + $0x5c] sm:$0xf0]  ;;  %v572_v14 = vld [vmem:[#allocation6 + $0x44] sm:$0xf] }
  0x17   :  { %253 = vmatpush.bf16.msra.mxu0 %v526_v3  ;;  %v538_v12 = vor.u32 %v581_v9, %v535_v10  ;;  %v495_v15 = vld [vmem:[#allocation6 + $0x60] sm:$0xf0]  ;;  %266 = vmatpush.bf16.msra.mxu1 %v530_v7  ;;  %v494_v16 = vor.u32 %v576_v13, %v493_v11  ;;  %v501_v18 = vld [vmem:[#allocation6 + $0x48] sm:$0xf]  ;;  %v573_v20 = vld [vmem:[#allocation6 + $0x4c] sm:$0xf] }
  0x18   :  { %279 = vmatpush.bf16.msra.mxu2 %v534_v8  ;;  %v498_v17 = vor.u32 %v572_v14, %v495_v15  ;;  %v577_v19 = vld [vmem:[#allocation6 + $0x64] sm:$0xf0]  ;;  %v503_v22 = vld [vmem:[#allocation6 + $0x68] sm:$0xf0]  ;;  %v461_v23 = vld [vmem:[#allocation6] sm:$0xf] }
  0x19   :  { %292 = vmatpush.bf16.msra.mxu3 %v538_v12  ;;  %v502_v21 = vor.u32 %v577_v19, %v501_v18  ;;  %v568_v24 = vld [vmem:[#allocation6 + $0x1c] sm:$0xf0]  ;;  %v506_v25 = vor.u32 %v573_v20, %v503_v22  ;;  %v564_v26 = vld [vmem:[#allocation6 + $0x4] sm:$0xf]  ;;  %v469_v28 = vld [vmem:[#allocation6 + $0x8] sm:$0xf] }
  0x1a   :  { %v463_v27 = vld [vmem:[#allocation6 + $0x20] sm:$0xf0]  ;;  %v462_v29 = vor.u32 %v568_v24, %v461_v23  ;;  %v569_v30 = vld [vmem:[#allocation6 + $0x24] sm:$0xf0]  ;;  %v565_v31 = vld [vmem:[#allocation6 + $0xc] sm:$0xf] }
  0x1b   :  { %254 = vmatpush.bf16.msra.mxu0 %v494_v16  ;;  %v471_v32 = vld [vmem:[#allocation6 + $0x28] sm:$0xf0]  ;;  %267 = vmatpush.bf16.msra.mxu1 %v498_v17  ;;  %v466_v33 = vor.u32 %v564_v26, %v463_v27  ;;  %v470_v34 = vor.u32 %v569_v30, %v469_v28  ;;  %v80_v35 = vld [vmem:[#allocation3] sm:$0xff]  ;;  %v541_v40 = vld [vmem:[#allocation6 + $0x90] sm:$0xf]  ;;  %vm244_vm0 = vcmask 392192  }
  0x1c   :  { %280 = vmatpush.bf16.msra.mxu2 %v502_v21  ;;  %v549_v36 = vld [vmem:[#allocation6 + $0x98] sm:$0xf]  ;;  %v474_v38 = vor.u32 %v565_v31, %v471_v32  ;;  %v586_v41 = vld [vmem:[#allocation6 + $0xac] sm:$0xf0]  ;;  %v583_v42 = vld [vmem:[#allocation6 + $0x9c] sm:$0xf]  ;;  %v81_v43 = vpack.c.bf16 %v80_v35, %v80_v35 }
  0x1d   :  { %v587_v37 = vld [vmem:[#allocation6 + $0xb4] sm:$0xf0]  ;;  %293 = vmatpush.bf16.msra.mxu3 %v506_v25  ;;  %v551_v44 = vld [vmem:[#allocation6 + $0xb8] sm:$0xf0]  ;;  %v582_v45 = vld [vmem:[#allocation6 + $0x94] sm:$0xf]  ;;  %v542_v50 = vor.u32 %v586_v41, %v541_v40 }
  0x1e   :  { %v550_v39 = vor.u32 %v587_v37, %v549_v36  ;;  %v543_v46 = vld [vmem:[#allocation6 + $0xb0] sm:$0xf0]  ;;  %v554_v47 = vor.u32 %v583_v42, %v551_v44  ;;  %v517_v48 = vld [vmem:[#allocation6 + $0x58] sm:$0xf]  ;;  %v575_v51 = vld [vmem:[#allocation6 + $0x5c] sm:$0xf] }
  0x1f   :  { %255 = vmatpush.bf16.msra.mxu0 %v462_v29  ;;  %v579_v49 = vld [vmem:[#allocation6 + $0x74] sm:$0xf0]  ;;  %268 = vmatpush.bf16.msra.mxu1 %v466_v33  ;;  %v519_v52 = vld [vmem:[#allocation6 + $0x78] sm:$0xf0]  ;;  %v546_v53 = vor.u32 %v582_v45, %v543_v46  ;;  %v509_v55 = vld [vmem:[#allocation6 + $0x50] sm:$0xf] }
  0x20   :  { %281 = vmatpush.bf16.msra.mxu2 %v470_v34  ;;  %v518_v54 = vor.u32 %v579_v49, %v517_v48  ;;  %v578_v56 = vld [vmem:[#allocation6 + $0x6c] sm:$0xf0]  ;;  %v574_v57 = vld [vmem:[#allocation6 + $0x54] sm:$0xf]  ;;  %v522_v58 = vor.u32 %v575_v51, %v519_v52  ;;  %v485_v60 = vld [vmem:[#allocation6 + $0x18] sm:$0xf] }
  0x21   :  { %294 = vmatpush.bf16.msra.mxu3 %v474_v38  ;;  %v511_v59 = vld [vmem:[#allocation6 + $0x70] sm:$0xf0]  ;;  %v571_v61 = vld [vmem:[#allocation6 + $0x34] sm:$0xf0]  ;;  %v567_v62 = vld [vmem:[#allocation6 + $0x1c] sm:$0xf]  ;;  %v510_v63 = vor.u32 %v578_v56, %v509_v55 }
  0x22   :  { %555 = vmatmul.msk.bf16.vlgmr.msra.gmra.mxu0 %vm244_vm0, %v81_v43  ;;  %556 = vmatmul.msk.bf16.vlgmr.msra.gmra.mxu1 %vm244_vm0, %v81_v43  ;;  %v487_v0 = vld [vmem:[#allocation6 + $0x38] sm:$0xf0]  ;;  %v514_v1 = vor.u32 %v574_v57, %v511_v59  ;;  %v486_v2 = vor.u32 %v571_v61, %v485_v60  ;;  %v477_v3 = vld [vmem:[#allocation6 + $0x10] sm:$0xf]  ;;  %v566_v5 = vld [vmem:[#allocation6 + $0x14] sm:$0xf] }
  0x23   :  { %557 = vmatmul.msk.bf16.vlgmr.msra.gmra.mxu2 %vm244_vm0, %v81_v43  ;;  %305 = vmatpush.bf16.msrb.mxu0 %v542_v50  ;;  %v570_v4 = vld [vmem:[#allocation6 + $0x2c] sm:$0xf0]  ;;  %v479_v6 = vld [vmem:[#allocation6 + $0x30] sm:$0xf0]  ;;  %v490_v7 = vor.u32 %v567_v62, %v487_v0  ;;  %v784_v10 = vld [vmem:[#allocation8] sm:$0xff]  ;;  %s447_s16 = sshll.u32 %s815_s5, 4  ;;  %s448_s16 = int_to_ptr.hbm [resolvable:$true] %s447_s16 }
  0x24   :  { %331 = vmatpush.bf16.msrb.mxu2 %v550_v39  ;;  %558 = vmatmul.msk.bf16.vlgmr.msra.gmra.mxu3 %vm244_vm0, %v81_v43  ;;  %v478_v8 = vor.u32 %v570_v4, %v477_v3  ;;  %v482_v9 = vor.u32 %v566_v5, %v479_v6  ;;  %v108_v11 = vperm.slane %v784_v10, 0  ;;  %v109_v12 = vperm.slane %v784_v10, 1  ;;  %v789_v19 = vld [vmem:[#allocation9] sm:$0xff] }
  0x25   :  { %344 = vmatpush.bf16.msrb.mxu3 %v554_v47  ;;  %318 = vmatpush.bf16.msrb.mxu1 %v546_v53  ;;  %v110_v17 = vperm.slane %v784_v10, 2  ;;  %v111_v21 = vperm.slane %v784_v10, 3  ;;  %v378_v27 = vperm.slane %v789_v19, 0  ;;  %v379_v28 = vperm.slane %v789_v19, 1 }
  0x26   :  { %v380_v33 = vperm.slane %v789_v19, 2  ;;  %v112_v37 = vperm.slane %v784_v10, 4  ;;  %v113_v39 = vperm.slane %v784_v10, 5  ;;  %v381_v45 = vperm.slane %v789_v19, 3 }
  0x27   :  { %306 = vmatpush.bf16.msrb.mxu0 %v510_v63  ;;  %v382_v49 = vperm.slane %v789_v19, 4  ;;  %v115_v57 = vperm.slane %v784_v10, 7  ;;  %v384_v4 = vperm.slane %v789_v19, 6  ;;  %vm438_vm13 = vcmask 57344  }
  0x28   :  { %332 = vmatpush.bf16.msrb.mxu2 %v518_v54  ;;  %v114_v54 = vperm.slane %v784_v10, 6 }
  0x29   :  { %345 = vmatpush.bf16.msrb.mxu3 %v522_v58  ;;  %319 = vmatpush.bf16.msrb.mxu1 %v514_v1  ;;  %v383_v58 = vperm.slane %v789_v19, 5 }
  0x2b   :  { %307 = vmatpush.bf16.msrb.mxu0 %v478_v8 }
  0x2c   :  { %333 = vmatpush.bf16.msrb.mxu2 %v486_v2 }
  0x2d   :  { %346 = vmatpush.bf16.msrb.mxu3 %v490_v7  ;;  %320 = vmatpush.bf16.msrb.mxu1 %v482_v9  ;;  %v385_v9 = vperm.slane %v789_v19, 7 }
  0x32   :  { %559 = vmatmul.msk.bf16.vlgmr.msrb.gmra.mxu0 %vm244_vm0, %v81_v43  ;;  %560 = vmatmul.msk.bf16.vlgmr.msrb.gmra.mxu1 %vm244_vm0, %v81_v43 }
  0x33   :  { %561 = vmatmul.msk.bf16.vlgmr.msrb.gmra.mxu2 %vm244_vm0, %v81_v43 }
  0x34   :  { %562 = vmatmul.msk.bf16.vlgmr.msrb.gmra.mxu3 %vm244_vm0, %v81_v43 }
  0x9f   :  { %v257_v13 = vpop.f32.mrf.mxu0  ;;  %v270_v15 = vpop.f32.mrf.mxu1 }
  0xa0   :  { %v258_v14 = vadd.f32 %v257_v13, %v108_v11  ;;  %v271_v16 = vadd.f32 %v270_v15, %v109_v12 }
  0xa2   :  { %v360_v18 = vmul.f32 0.01, %v258_v14  ;;  %vm352_vm1 = vcmp.ge.f32.partialorder %v258_v14, 0.0  ;;  %v361_v20 = vmul.f32 0.01, %v271_v16  ;;  %vm353_vm2 = vcmp.ge.f32.partialorder %v271_v16, 0.0 }
  0xa4   :  { %v368_v26 = vsel %vm352_vm1, %v258_v14, %v360_v18  ;;  %v369_v30 = vsel %vm353_vm2, %v271_v16, %v361_v20  ;;  %v412_v20 = vstv %s814_s4  ;;  %s733_s4 = smov [#allocation11]  }
  0xa5   :  { %v394_v35 = vmul.f32 %v378_v27, %v368_v26  ;;  %v395_v36 = vmul.f32 %v379_v28, %v369_v30  ;;  %v434_v28 = vlaneseq  ;;  %s445_s13 = sshll.u32 %s733_s4, 4  ;;  %s446_s13 = int_to_ptr.vmem [resolvable:$true] %s445_s13 }
  0xa6   :  { %v283_v22 = vpop.f32.mrf.mxu2 }
  0xa7   :  { %v284_v23 = vadd.f32 %v283_v22, %v110_v17  ;;  %v296_v24 = vpop.f32.mrf.mxu3  ;;  %v259_v25 = vpop.f32.mrf.mxu0  ;;  %v402_v44 = vadd.f32 %v395_v36, %v394_v35 }
  0xa8   :  { %v272_v29 = vpop.f32.mrf.mxu1  ;;  %v297_v32 = vadd.f32 %v296_v24, %v111_v21 }
  0xa9   :  { %vm354_vm3 = vcmp.ge.f32.partialorder %v284_v23, 0.0  ;;  %v362_v31 = vmul.f32 0.01, %v284_v23 }
  0xaa   :  { %v363_v38 = vmul.f32 0.01, %v297_v32  ;;  %vm355_vm4 = vcmp.ge.f32.partialorder %v297_v32, 0.0 }
  0xab   :  { %v370_v34 = vsel %vm354_vm3, %v284_v23, %v362_v31 }
  0xac   :  { %v396_v40 = vmul.f32 %v380_v33, %v370_v34  ;;  %v371_v48 = vsel %vm355_vm4, %v297_v32, %v363_v38  ;;  %v435_v33 = vand.u32 127, %v434_v28 }
  0xad   :  { %v397_v55 = vmul.f32 %v381_v45, %v371_v48 }
  0xae   :  { %v285_v41 = vpop.f32.mrf.mxu2  ;;  %v403_v51 = vadd.f32 %v402_v44, %v396_v40 }
  0xaf   :  { %v298_v42 = vpop.f32.mrf.mxu3  ;;  %v309_v43 = vpop.f32.mrf.mxu0 }
  0xb0   :  { %v310_v46 = vadd.f32 %v309_v43, %v112_v37  ;;  %v322_v47 = vpop.f32.mrf.mxu1  ;;  %v404_v62 = vadd.f32 %v403_v51, %v397_v55 }
  0xb1   :  { %v323_v50 = vadd.f32 %v322_v47, %v113_v39 }
  0xb2   :  { %vm356_vm5 = vcmp.ge.f32.partialorder %v310_v46, 0.0  ;;  %v364_v52 = vmul.f32 0.01, %v310_v46 }
  0xb3   :  { %vm357_vm6 = vcmp.ge.f32.partialorder %v323_v50, 0.0  ;;  %v365_v53 = vmul.f32 0.01, %v323_v50 }
  0xb4   :  { %v372_v56 = vsel %vm356_vm5, %v310_v46, %v364_v52 }
  0xb5   :  { %v398_v59 = vmul.f32 %v382_v49, %v372_v56  ;;  %v373_v60 = vsel %vm357_vm6, %v323_v50, %v365_v53 }
  0xb6   :  { %v335_v61 = vpop.f32.mrf.mxu2  ;;  %v399_v5 = vmul.f32 %v383_v58, %v373_v60 }
  0xb7   :  { %v336_v63 = vadd.f32 %v335_v61, %v114_v54  ;;  %v348_v0 = vpop.f32.mrf.mxu3  ;;  %v311_v1 = vpop.f32.mrf.mxu0  ;;  %v405_v6 = vadd.f32 %v404_v62, %v398_v59 }
  0xb8   :  { %v349_v2 = vadd.f32 %v348_v0, %v115_v57  ;;  %v324_v3 = vpop.f32.mrf.mxu1 }
  0xb9   :  { %vm358_vm7 = vcmp.ge.f32.partialorder %v336_v63, 0.0  ;;  %v366_v7 = vmul.f32 0.01, %v336_v63  ;;  %v406_v13 = vadd.f32 %v405_v6, %v399_v5 }
  0xba   :  { %vm359_vm8 = vcmp.ge.f32.partialorder %v349_v2, 0.0  ;;  %v367_v8 = vmul.f32 0.01, %v349_v2 }
  0xbb   :  { %v374_v10 = vsel %vm358_vm7, %v336_v63, %v366_v7 }
  0xbc   :  { %v375_v11 = vsel %vm359_vm8, %v349_v2, %v367_v8  ;;  %v400_v12 = vmul.f32 %v384_v4, %v374_v10 }
  0xbd   :  { %v401_v15 = vmul.f32 %v385_v9, %v375_v11 }
  0xbe   :  { %v337_v14 = vpop.f32.mrf.mxu2  ;;  %v407_v16 = vadd.f32 %v406_v13, %v400_v12 }
  0xbf   :  { %v350_v17 = vpop.f32.mrf.mxu3 }
  0xc0   :  { %v408_v18 = vadd.f32 %v407_v16, %v401_v15 }
  0xc2   :  { %409 = vadd.xlane.f32.xlu0 %v408_v18 }
 0x135   :  { %v410_v21 = vpop.xlane.xlu0 %409 }
 0x136   :  { %v413_v22 = vadd.f32 %v412_v20, %v410_v21 }
 0x138   :  { %v563_v23 = vmul.f32 -1.442695, %v413_v22 }
 0x13a   :  { %595 = vpow2.f32 %v563_v23 }
 0x140   :  { %v596_v24 = vpop.eup %595 }
 0x141   :  { %v417_v19 = vadd.f32 1.0, %v596_v24 }
 0x143   :  { %597 = vrcp.f32 %v417_v19  ;;  %v429_v29 = vand.u32 2147483648, %v417_v19  ;;  %v427_v31 = vand.u32 2147483647, %v417_v19  ;;  %vm423_vm10 = vweird.f32 %v417_v19 }
 0x145   :  { %v430_v34 = vor.u32 1.1754944e-38, %v429_v29  ;;  %vm428_vm12 = vcmp.eq.f32.partialorder %v427_v31, 8.507059e+37 }
 0x149   :  { %v598_v25 = vpop.eup %597 }
 0x14a   :  { %v419_v26 = vmul.f32 %v598_v25, %v417_v19  ;;  %vm424_vm9 = vweird.f32 %v598_v25 }
 0x14b   :  { %vm425_vm11 = vmor %vm423_vm10, %vm424_vm9 }
 0x14c   :  { %v420_v27 = vsub.f32 1.0, %v419_v26 }
 0x14e   :  { %v421_v30 = vmul.f32 %v598_v25, %v420_v27 }
 0x150   :  { %v422_v32 = vadd.f32 %v598_v25, %v421_v30 }
 0x152   :  { %v426_v35 = vsel %vm425_vm11, %v598_v25, %v422_v32 }
 0x153   :  { %v431_v36 = vsel %vm428_vm12, %v430_v34, %v426_v35 }
 0x154   :  { %v436_v37 = vperm.slane %v431_v36, %v435_v33 }
 0x156   :  { %439 = vst.msk [vmem:[#allocation11] sm:$0x1] %vm438_vm13, %v436_v37 }
 0x157   :  { %450 = dma.vmem_to_hbm [thread:$0]  %s446_s13, 16, %s448_s16, [#allocation5]  }
 0x158   :  { %725 = dma.done.wait [#allocation5], 16  }
 0x159   :  { %726 = vsyncadd [#allocation5], 4294967280 }
 0x15a   :  { %455 = vsyncpa [#allocation4], 1 }
 0x15b   :  { %456 = vsyncpa [#allocation7], 1 }
 0x15c   :  { %457 = vsyncpa [#allocation10], 1 }
 0x15d   :  { %458 = vsyncpa [#allocation5], 1 }

</bundles_post_ra>
